<compile_context>
chip_gen: v5e
topology: v5e:2x2
jax: 0.10.0
libtpu: 0.0.40
codegen_flags: <defaults>
</compile_context>

<pallas_src>
import jax
import jax.numpy as jnp
from jax.experimental import pallas as pl
from jax.experimental.pallas import tpu as pltpu

LANES = 128
SUBLANES = 8

# Packed parameter layout (f32, 58 used, padded to 64):
#   [0:3)   fc1.W[0, j]   (1 -> 3)
#   [3:6)   fc1.b[j]
#   for l in 0..3 (fc11, fc12, fc13, fc14), base = 6 + 12*l:
#     [base + 3*i + j]  W[i, j]   (3 -> 3, row-major (in, out))
#     [base + 9 + j]    b[j]
#   [54:57) fc2.W[i, 0]   (3 -> 1)
#   [57]    fc2.b[0]
_HIDDEN_BASE = 6
_OUT_BASE = 6 + 4 * 12
_N_PARAMS = _OUT_BASE + 4  # 58


def mlp_kernel(params_ref, x_ref, o_ref):
    x = x_ref[...]  # (block_rows, 128) f32, batch on lanes

    def p(i):  # scalar read from SMEM; broadcasts into VPU multiply-adds
        return params_ref[i]

    # fc1: 1 -> 3   h[j] = relu(x * w1[j] + b1[j])
    h = [jnp.maximum(x * p(j) + p(3 + j), 0.0) for j in range(3)]

    # fc11 .. fc14: 3 -> 3, pure VPU broadcast multiply-adds (no MXU)
    for layer in range(4):
        base = _HIDDEN_BASE + 12 * layer
        new_h = []
        for j in range(3):
            acc = h[0] * p(base + j)
            acc = acc + h[1] * p(base + 3 + j)
            acc = acc + h[2] * p(base + 6 + j)
            new_h.append(jnp.maximum(acc + p(base + 9 + j), 0.0))
        h = new_h

    # fc2: 3 -> 1 (no ReLU)
    out = h[0] * p(_OUT_BASE) + h[1] * p(_OUT_BASE + 1) + h[2] * p(_OUT_BASE + 2)
    o_ref[...] = (out + p(_OUT_BASE + 3)).astype(o_ref.dtype)


def pack_params(params):
    """params: [(W, b)] * 6 with W as (in, out), b as (out,). Returns flat f32[64]."""
    flat = []
    for w, b in params:
        flat.append(jnp.asarray(w, jnp.float32).reshape(-1))  # row-major (in, out)
        flat.append(jnp.asarray(b, jnp.float32).reshape(-1))
    packed = jnp.concatenate(flat)
    assert packed.shape[0] == _N_PARAMS
    return jnp.pad(packed, (0, 64 - _N_PARAMS))


def simple_nn_forward(x, params, *, block_rows=512):
    """x: (..., 1) f32 (torch nn.Linear convention).  Returns (..., 1) f32."""
    assert x.shape[-1] == 1
    lead_shape = x.shape[:-1]
    x_flat = x.reshape(-1).astype(jnp.float32)
    B = x_flat.shape[0]
    packed = pack_params(params)

    # Lane-dense layout: B scalars -> (rows_padded, 128), rows blocked by `blk`.
    rows = max(pl.cdiv(B, LANES), 1)
    rows_rounded = ((rows + SUBLANES - 1) // SUBLANES) * SUBLANES
    blk = max(SUBLANES, min(block_rows, rows_rounded))
    blk = (blk // SUBLANES) * SUBLANES
    rows_padded = ((rows_rounded + blk - 1) // blk) * blk
    n_pad = rows_padded * LANES - B

    x2d = jnp.pad(x_flat, (0, n_pad)).reshape(rows_padded, LANES)

    out2d = pl.pallas_call(
        mlp_kernel,
        out_shape=jax.ShapeDtypeStruct((rows_padded, LANES), jnp.float32),
        grid=(rows_padded // blk,),
        in_specs=[
            pl.BlockSpec(memory_space=pltpu.MemorySpace.SMEM),  # packed params (f32[64])
            pl.BlockSpec((blk, LANES), lambda i: (i, 0)),       # batch rows
        ],
        out_specs=pl.BlockSpec((blk, LANES), lambda i: (i, 0)),
        compiler_params=pltpu.CompilerParams(
            dimension_semantics=("parallel",),
        ),
    )(packed, x2d)

    return out2d.reshape(-1)[:B].reshape(lead_shape + (1,))


def init_params(key):
    """Deterministic init mimicking nn.Linear's U(-1/sqrt(fan_in), 1/sqrt(fan_in))."""
    dims = [(1, 3), (3, 3), (3, 3), (3, 3), (3, 3), (3, 1)]
    params = []
    for fan_in, fan_out in dims:
        key, kw, kb = jax.random.split(key, 3)
        bound = 1.0 / (fan_in ** 0.5)
        w = jax.random.uniform(kw, (fan_in, fan_out), jnp.float32, -bound, bound)
        b = jax.random.uniform(kb, (fan_out,), jnp.float32, -bound, bound)
        params.append((w, b))
    return params


def reference_forward(x, params):
    h = x
    for i, (w, b) in enumerate(params):
        h = h @ w + b
        if i < len(params) - 1:
            h = jnp.maximum(h, 0.0)
    return h


if __name__ == "__main__":
    key = jax.random.PRNGKey(0)
    key, kx1, kx2 = jax.random.split(key, 3)
    params = init_params(key)

    # Small batch (matches the torch module's (N, 1) input convention).
    B = 8
    x = jax.random.normal(kx1, (B, 1), jnp.float32)
    out = jax.block_until_ready(simple_nn_forward(x, params))
    ref = reference_forward(x, params)
    assert out.shape == (B, 1)
    assert jnp.allclose(out, ref, atol=1e-5, rtol=1e-5)

    # Larger, non-multiple-of-tile batch to exercise padding + the parallel grid.
    B2 = 3000
    x2 = jax.random.normal(kx2, (B2, 1), jnp.float32)
    out2 = jax.block_until_ready(simple_nn_forward(x2, params, block_rows=8))
    ref2 = reference_forward(x2, params)
    assert out2.shape == (B2, 1)
    assert jnp.allclose(out2, ref2, atol=1e-5, rtol=1e-5)

    print("KERNEL_OK")
</pallas_src>

<mosaic_0001>
module attributes {stable_mosaic.version = 11 : i64} {
  func.func @mlp_kernel(%arg0: i32, %arg1: memref<64xf32, #tpu.memory_space<smem>>, %arg2: memref<8x128xf32, #tpu.memory_space<vmem>>, %arg3: memref<8x128xf32, #tpu.memory_space<vmem>>) attributes {dimension_semantics = [#tpu.dimension_semantics<parallel>], iteration_bounds = array<i64: 1>, scalar_prefetch = 0 : i64, scratch_operands = 0 : i64, tpu.core_type = #tpu.core_type<tc>, window_params = [{transform_indices = @transform_0, window_bounds = array<i64: 64>}, {transform_indices = @transform_1, window_bounds = array<i64: 8, 128>}, {transform_indices = @transform_2, window_bounds = array<i64: 8, 128>}]} {
    %c0 = arith.constant 0 : index
    %c0_0 = arith.constant 0 : index
    %0 = vector.load %arg2[%c0, %c0_0] : memref<8x128xf32, #tpu.memory_space<vmem>>, vector<8x128xf32>
    %c0_1 = arith.constant 0 : index
    %1 = memref.load %arg1[%c0_1] : memref<64xf32, #tpu.memory_space<smem>>
    %2 = vector.broadcast %1 : f32 to vector<8x128xf32>
    %3 = arith.mulf %0, %2 : vector<8x128xf32>
    %c3 = arith.constant 3 : index
    %4 = memref.load %arg1[%c3] : memref<64xf32, #tpu.memory_space<smem>>
    %5 = vector.broadcast %4 : f32 to vector<8x128xf32>
    %6 = arith.addf %3, %5 : vector<8x128xf32>
    %cst = arith.constant 0.000000e+00 : f32
    %7 = vector.broadcast %cst : f32 to vector<8x128xf32>
    %8 = arith.maximumf %6, %7 : vector<8x128xf32>
    %c1 = arith.constant 1 : index
    %9 = memref.load %arg1[%c1] : memref<64xf32, #tpu.memory_space<smem>>
    %10 = vector.broadcast %9 : f32 to vector<8x128xf32>
    %11 = arith.mulf %0, %10 : vector<8x128xf32>
    %c4 = arith.constant 4 : index
    %12 = memref.load %arg1[%c4] : memref<64xf32, #tpu.memory_space<smem>>
    %13 = vector.broadcast %12 : f32 to vector<8x128xf32>
    %14 = arith.addf %11, %13 : vector<8x128xf32>
    %cst_2 = arith.constant 0.000000e+00 : f32
    %15 = vector.broadcast %cst_2 : f32 to vector<8x128xf32>
    %16 = arith.maximumf %14, %15 : vector<8x128xf32>
    %c2 = arith.constant 2 : index
    %17 = memref.load %arg1[%c2] : memref<64xf32, #tpu.memory_space<smem>>
    %18 = vector.broadcast %17 : f32 to vector<8x128xf32>
    %19 = arith.mulf %0, %18 : vector<8x128xf32>
    %c5 = arith.constant 5 : index
    %20 = memref.load %arg1[%c5] : memref<64xf32, #tpu.memory_space<smem>>
    %21 = vector.broadcast %20 : f32 to vector<8x128xf32>
    %22 = arith.addf %19, %21 : vector<8x128xf32>
    %cst_3 = arith.constant 0.000000e+00 : f32
    %23 = vector.broadcast %cst_3 : f32 to vector<8x128xf32>
    %24 = arith.maximumf %22, %23 : vector<8x128xf32>
    %c6 = arith.constant 6 : index
    %25 = memref.load %arg1[%c6] : memref<64xf32, #tpu.memory_space<smem>>
    %26 = vector.broadcast %25 : f32 to vector<8x128xf32>
    %27 = arith.mulf %8, %26 : vector<8x128xf32>
    %c9 = arith.constant 9 : index
    %28 = memref.load %arg1[%c9] : memref<64xf32, #tpu.memory_space<smem>>
    %29 = vector.broadcast %28 : f32 to vector<8x128xf32>
    %30 = arith.mulf %16, %29 : vector<8x128xf32>
    %31 = arith.addf %27, %30 : vector<8x128xf32>
    %c12 = arith.constant 12 : index
    %32 = memref.load %arg1[%c12] : memref<64xf32, #tpu.memory_space<smem>>
    %33 = vector.broadcast %32 : f32 to vector<8x128xf32>
    %34 = arith.mulf %24, %33 : vector<8x128xf32>
    %35 = arith.addf %31, %34 : vector<8x128xf32>
    %c15 = arith.constant 15 : index
    %36 = memref.load %arg1[%c15] : memref<64xf32, #tpu.memory_space<smem>>
    %37 = vector.broadcast %36 : f32 to vector<8x128xf32>
    %38 = arith.addf %35, %37 : vector<8x128xf32>
    %cst_4 = arith.constant 0.000000e+00 : f32
    %39 = vector.broadcast %cst_4 : f32 to vector<8x128xf32>
    %40 = arith.maximumf %38, %39 : vector<8x128xf32>
    %c7 = arith.constant 7 : index
    %41 = memref.load %arg1[%c7] : memref<64xf32, #tpu.memory_space<smem>>
    %42 = vector.broadcast %41 : f32 to vector<8x128xf32>
    %43 = arith.mulf %8, %42 : vector<8x128xf32>
    %c10 = arith.constant 10 : index
    %44 = memref.load %arg1[%c10] : memref<64xf32, #tpu.memory_space<smem>>
    %45 = vector.broadcast %44 : f32 to vector<8x128xf32>
    %46 = arith.mulf %16, %45 : vector<8x128xf32>
    %47 = arith.addf %43, %46 : vector<8x128xf32>
    %c13 = arith.constant 13 : index
    %48 = memref.load %arg1[%c13] : memref<64xf32, #tpu.memory_space<smem>>
    %49 = vector.broadcast %48 : f32 to vector<8x128xf32>
    %50 = arith.mulf %24, %49 : vector<8x128xf32>
    %51 = arith.addf %47, %50 : vector<8x128xf32>
    %c16 = arith.constant 16 : index
    %52 = memref.load %arg1[%c16] : memref<64xf32, #tpu.memory_space<smem>>
    %53 = vector.broadcast %52 : f32 to vector<8x128xf32>
    %54 = arith.addf %51, %53 : vector<8x128xf32>
    %cst_5 = arith.constant 0.000000e+00 : f32
    %55 = vector.broadcast %cst_5 : f32 to vector<8x128xf32>
    %56 = arith.maximumf %54, %55 : vector<8x128xf32>
    %c8 = arith.constant 8 : index
    %57 = memref.load %arg1[%c8] : memref<64xf32, #tpu.memory_space<smem>>
    %58 = vector.broadcast %57 : f32 to vector<8x128xf32>
    %59 = arith.mulf %8, %58 : vector<8x128xf32>
    %c11 = arith.constant 11 : index
    %60 = memref.load %arg1[%c11] : memref<64xf32, #tpu.memory_space<smem>>
    %61 = vector.broadcast %60 : f32 to vector<8x128xf32>
    %62 = arith.mulf %16, %61 : vector<8x128xf32>
    %63 = arith.addf %59, %62 : vector<8x128xf32>
    %c14 = arith.constant 14 : index
    %64 = memref.load %arg1[%c14] : memref<64xf32, #tpu.memory_space<smem>>
    %65 = vector.broadcast %64 : f32 to vector<8x128xf32>
    %66 = arith.mulf %24, %65 : vector<8x128xf32>
    %67 = arith.addf %63, %66 : vector<8x128xf32>
    %c17 = arith.constant 17 : index
    %68 = memref.load %arg1[%c17] : memref<64xf32, #tpu.memory_space<smem>>
    %69 = vector.broadcast %68 : f32 to vector<8x128xf32>
    %70 = arith.addf %67, %69 : vector<8x128xf32>
    %cst_6 = arith.constant 0.000000e+00 : f32
    %71 = vector.broadcast %cst_6 : f32 to vector<8x128xf32>
    %72 = arith.maximumf %70, %71 : vector<8x128xf32>
    %c18 = arith.constant 18 : index
    %73 = memref.load %arg1[%c18] : memref<64xf32, #tpu.memory_space<smem>>
    %74 = vector.broadcast %73 : f32 to vector<8x128xf32>
    %75 = arith.mulf %40, %74 : vector<8x128xf32>
    %c21 = arith.constant 21 : index
    %76 = memref.load %arg1[%c21] : memref<64xf32, #tpu.memory_space<smem>>
    %77 = vector.broadcast %76 : f32 to vector<8x128xf32>
    %78 = arith.mulf %56, %77 : vector<8x128xf32>
    %79 = arith.addf %75, %78 : vector<8x128xf32>
    %c24 = arith.constant 24 : index
    %80 = memref.load %arg1[%c24] : memref<64xf32, #tpu.memory_space<smem>>
    %81 = vector.broadcast %80 : f32 to vector<8x128xf32>
    %82 = arith.mulf %72, %81 : vector<8x128xf32>
    %83 = arith.addf %79, %82 : vector<8x128xf32>
    %c27 = arith.constant 27 : index
    %84 = memref.load %arg1[%c27] : memref<64xf32, #tpu.memory_space<smem>>
    %85 = vector.broadcast %84 : f32 to vector<8x128xf32>
    %86 = arith.addf %83, %85 : vector<8x128xf32>
    %cst_7 = arith.constant 0.000000e+00 : f32
    %87 = vector.broadcast %cst_7 : f32 to vector<8x128xf32>
    %88 = arith.maximumf %86, %87 : vector<8x128xf32>
    %c19 = arith.constant 19 : index
    %89 = memref.load %arg1[%c19] : memref<64xf32, #tpu.memory_space<smem>>
    %90 = vector.broadcast %89 : f32 to vector<8x128xf32>
    %91 = arith.mulf %40, %90 : vector<8x128xf32>
    %c22 = arith.constant 22 : index
    %92 = memref.load %arg1[%c22] : memref<64xf32, #tpu.memory_space<smem>>
    %93 = vector.broadcast %92 : f32 to vector<8x128xf32>
    %94 = arith.mulf %56, %93 : vector<8x128xf32>
    %95 = arith.addf %91, %94 : vector<8x128xf32>
    %c25 = arith.constant 25 : index
    %96 = memref.load %arg1[%c25] : memref<64xf32, #tpu.memory_space<smem>>
    %97 = vector.broadcast %96 : f32 to vector<8x128xf32>
    %98 = arith.mulf %72, %97 : vector<8x128xf32>
    %99 = arith.addf %95, %98 : vector<8x128xf32>
    %c28 = arith.constant 28 : index
    %100 = memref.load %arg1[%c28] : memref<64xf32, #tpu.memory_space<smem>>
    %101 = vector.broadcast %100 : f32 to vector<8x128xf32>
    %102 = arith.addf %99, %101 : vector<8x128xf32>
    %cst_8 = arith.constant 0.000000e+00 : f32
    %103 = vector.broadcast %cst_8 : f32 to vector<8x128xf32>
    %104 = arith.maximumf %102, %103 : vector<8x128xf32>
    %c20 = arith.constant 20 : index
    %105 = memref.load %arg1[%c20] : memref<64xf32, #tpu.memory_space<smem>>
    %106 = vector.broadcast %105 : f32 to vector<8x128xf32>
    %107 = arith.mulf %40, %106 : vector<8x128xf32>
    %c23 = arith.constant 23 : index
    %108 = memref.load %arg1[%c23] : memref<64xf32, #tpu.memory_space<smem>>
    %109 = vector.broadcast %108 : f32 to vector<8x128xf32>
    %110 = arith.mulf %56, %109 : vector<8x128xf32>
    %111 = arith.addf %107, %110 : vector<8x128xf32>
    %c26 = arith.constant 26 : index
    %112 = memref.load %arg1[%c26] : memref<64xf32, #tpu.memory_space<smem>>
    %113 = vector.broadcast %112 : f32 to vector<8x128xf32>
    %114 = arith.mulf %72, %113 : vector<8x128xf32>
    %115 = arith.addf %111, %114 : vector<8x128xf32>
    %c29 = arith.constant 29 : index
    %116 = memref.load %arg1[%c29] : memref<64xf32, #tpu.memory_space<smem>>
    %117 = vector.broadcast %116 : f32 to vector<8x128xf32>
    %118 = arith.addf %115, %117 : vector<8x128xf32>
    %cst_9 = arith.constant 0.000000e+00 : f32
    %119 = vector.broadcast %cst_9 : f32 to vector<8x128xf32>
    %120 = arith.maximumf %118, %119 : vector<8x128xf32>
    %c30 = arith.constant 30 : index
    %121 = memref.load %arg1[%c30] : memref<64xf32, #tpu.memory_space<smem>>
    %122 = vector.broadcast %121 : f32 to vector<8x128xf32>
    %123 = arith.mulf %88, %122 : vector<8x128xf32>
    %c33 = arith.constant 33 : index
    %124 = memref.load %arg1[%c33] : memref<64xf32, #tpu.memory_space<smem>>
    %125 = vector.broadcast %124 : f32 to vector<8x128xf32>
    %126 = arith.mulf %104, %125 : vector<8x128xf32>
    %127 = arith.addf %123, %126 : vector<8x128xf32>
    %c36 = arith.constant 36 : index
    %128 = memref.load %arg1[%c36] : memref<64xf32, #tpu.memory_space<smem>>
    %129 = vector.broadcast %128 : f32 to vector<8x128xf32>
    %130 = arith.mulf %120, %129 : vector<8x128xf32>
    %131 = arith.addf %127, %130 : vector<8x128xf32>
    %c39 = arith.constant 39 : index
    %132 = memref.load %arg1[%c39] : memref<64xf32, #tpu.memory_space<smem>>
    %133 = vector.broadcast %132 : f32 to vector<8x128xf32>
    %134 = arith.addf %131, %133 : vector<8x128xf32>
    %cst_10 = arith.constant 0.000000e+00 : f32
    %135 = vector.broadcast %cst_10 : f32 to vector<8x128xf32>
    %136 = arith.maximumf %134, %135 : vector<8x128xf32>
    %c31 = arith.constant 31 : index
    %137 = memref.load %arg1[%c31] : memref<64xf32, #tpu.memory_space<smem>>
    %138 = vector.broadcast %137 : f32 to vector<8x128xf32>
    %139 = arith.mulf %88, %138 : vector<8x128xf32>
    %c34 = arith.constant 34 : index
    %140 = memref.load %arg1[%c34] : memref<64xf32, #tpu.memory_space<smem>>
    %141 = vector.broadcast %140 : f32 to vector<8x128xf32>
    %142 = arith.mulf %104, %141 : vector<8x128xf32>
    %143 = arith.addf %139, %142 : vector<8x128xf32>
    %c37 = arith.constant 37 : index
    %144 = memref.load %arg1[%c37] : memref<64xf32, #tpu.memory_space<smem>>
    %145 = vector.broadcast %144 : f32 to vector<8x128xf32>
    %146 = arith.mulf %120, %145 : vector<8x128xf32>
    %147 = arith.addf %143, %146 : vector<8x128xf32>
    %c40 = arith.constant 40 : index
    %148 = memref.load %arg1[%c40] : memref<64xf32, #tpu.memory_space<smem>>
    %149 = vector.broadcast %148 : f32 to vector<8x128xf32>
    %150 = arith.addf %147, %149 : vector<8x128xf32>
    %cst_11 = arith.constant 0.000000e+00 : f32
    %151 = vector.broadcast %cst_11 : f32 to vector<8x128xf32>
    %152 = arith.maximumf %150, %151 : vector<8x128xf32>
    %c32 = arith.constant 32 : index
    %153 = memref.load %arg1[%c32] : memref<64xf32, #tpu.memory_space<smem>>
    %154 = vector.broadcast %153 : f32 to vector<8x128xf32>
    %155 = arith.mulf %88, %154 : vector<8x128xf32>
    %c35 = arith.constant 35 : index
    %156 = memref.load %arg1[%c35] : memref<64xf32, #tpu.memory_space<smem>>
    %157 = vector.broadcast %156 : f32 to vector<8x128xf32>
    %158 = arith.mulf %104, %157 : vector<8x128xf32>
    %159 = arith.addf %155, %158 : vector<8x128xf32>
    %c38 = arith.constant 38 : index
    %160 = memref.load %arg1[%c38] : memref<64xf32, #tpu.memory_space<smem>>
    %161 = vector.broadcast %160 : f32 to vector<8x128xf32>
    %162 = arith.mulf %120, %161 : vector<8x128xf32>
    %163 = arith.addf %159, %162 : vector<8x128xf32>
    %c41 = arith.constant 41 : index
    %164 = memref.load %arg1[%c41] : memref<64xf32, #tpu.memory_space<smem>>
    %165 = vector.broadcast %164 : f32 to vector<8x128xf32>
    %166 = arith.addf %163, %165 : vector<8x128xf32>
    %cst_12 = arith.constant 0.000000e+00 : f32
    %167 = vector.broadcast %cst_12 : f32 to vector<8x128xf32>
    %168 = arith.maximumf %166, %167 : vector<8x128xf32>
    %c42 = arith.constant 42 : index
    %169 = memref.load %arg1[%c42] : memref<64xf32, #tpu.memory_space<smem>>
    %170 = vector.broadcast %169 : f32 to vector<8x128xf32>
    %171 = arith.mulf %136, %170 : vector<8x128xf32>
    %c45 = arith.constant 45 : index
    %172 = memref.load %arg1[%c45] : memref<64xf32, #tpu.memory_space<smem>>
    %173 = vector.broadcast %172 : f32 to vector<8x128xf32>
    %174 = arith.mulf %152, %173 : vector<8x128xf32>
    %175 = arith.addf %171, %174 : vector<8x128xf32>
    %c48 = arith.constant 48 : index
    %176 = memref.load %arg1[%c48] : memref<64xf32, #tpu.memory_space<smem>>
    %177 = vector.broadcast %176 : f32 to vector<8x128xf32>
    %178 = arith.mulf %168, %177 : vector<8x128xf32>
    %179 = arith.addf %175, %178 : vector<8x128xf32>
    %c51 = arith.constant 51 : index
    %180 = memref.load %arg1[%c51] : memref<64xf32, #tpu.memory_space<smem>>
    %181 = vector.broadcast %180 : f32 to vector<8x128xf32>
    %182 = arith.addf %179, %181 : vector<8x128xf32>
    %cst_13 = arith.constant 0.000000e+00 : f32
    %183 = vector.broadcast %cst_13 : f32 to vector<8x128xf32>
    %184 = arith.maximumf %182, %183 : vector<8x128xf32>
    %c43 = arith.constant 43 : index
    %185 = memref.load %arg1[%c43] : memref<64xf32, #tpu.memory_space<smem>>
    %186 = vector.broadcast %185 : f32 to vector<8x128xf32>
    %187 = arith.mulf %136, %186 : vector<8x128xf32>
    %c46 = arith.constant 46 : index
    %188 = memref.load %arg1[%c46] : memref<64xf32, #tpu.memory_space<smem>>
    %189 = vector.broadcast %188 : f32 to vector<8x128xf32>
    %190 = arith.mulf %152, %189 : vector<8x128xf32>
    %191 = arith.addf %187, %190 : vector<8x128xf32>
    %c49 = arith.constant 49 : index
    %192 = memref.load %arg1[%c49] : memref<64xf32, #tpu.memory_space<smem>>
    %193 = vector.broadcast %192 : f32 to vector<8x128xf32>
    %194 = arith.mulf %168, %193 : vector<8x128xf32>
    %195 = arith.addf %191, %194 : vector<8x128xf32>
    %c52 = arith.constant 52 : index
    %196 = memref.load %arg1[%c52] : memref<64xf32, #tpu.memory_space<smem>>
    %197 = vector.broadcast %196 : f32 to vector<8x128xf32>
    %198 = arith.addf %195, %197 : vector<8x128xf32>
    %cst_14 = arith.constant 0.000000e+00 : f32
    %199 = vector.broadcast %cst_14 : f32 to vector<8x128xf32>
    %200 = arith.maximumf %198, %199 : vector<8x128xf32>
    %c44 = arith.constant 44 : index
    %201 = memref.load %arg1[%c44] : memref<64xf32, #tpu.memory_space<smem>>
    %202 = vector.broadcast %201 : f32 to vector<8x128xf32>
    %203 = arith.mulf %136, %202 : vector<8x128xf32>
    %c47 = arith.constant 47 : index
    %204 = memref.load %arg1[%c47] : memref<64xf32, #tpu.memory_space<smem>>
    %205 = vector.broadcast %204 : f32 to vector<8x128xf32>
    %206 = arith.mulf %152, %205 : vector<8x128xf32>
    %207 = arith.addf %203, %206 : vector<8x128xf32>
    %c50 = arith.constant 50 : index
    %208 = memref.load %arg1[%c50] : memref<64xf32, #tpu.memory_space<smem>>
    %209 = vector.broadcast %208 : f32 to vector<8x128xf32>
    %210 = arith.mulf %168, %209 : vector<8x128xf32>
    %211 = arith.addf %207, %210 : vector<8x128xf32>
    %c53 = arith.constant 53 : index
    %212 = memref.load %arg1[%c53] : memref<64xf32, #tpu.memory_space<smem>>
    %213 = vector.broadcast %212 : f32 to vector<8x128xf32>
    %214 = arith.addf %211, %213 : vector<8x128xf32>
    %cst_15 = arith.constant 0.000000e+00 : f32
    %215 = vector.broadcast %cst_15 : f32 to vector<8x128xf32>
    %216 = arith.maximumf %214, %215 : vector<8x128xf32>
    %c54 = arith.constant 54 : index
    %217 = memref.load %arg1[%c54] : memref<64xf32, #tpu.memory_space<smem>>
    %218 = vector.broadcast %217 : f32 to vector<8x128xf32>
    %219 = arith.mulf %184, %218 : vector<8x128xf32>
    %c55 = arith.constant 55 : index
    %220 = memref.load %arg1[%c55] : memref<64xf32, #tpu.memory_space<smem>>
    %221 = vector.broadcast %220 : f32 to vector<8x128xf32>
    %222 = arith.mulf %200, %221 : vector<8x128xf32>
    %223 = arith.addf %219, %222 : vector<8x128xf32>
    %c56 = arith.constant 56 : index
    %224 = memref.load %arg1[%c56] : memref<64xf32, #tpu.memory_space<smem>>
    %225 = vector.broadcast %224 : f32 to vector<8x128xf32>
    %226 = arith.mulf %216, %225 : vector<8x128xf32>
    %227 = arith.addf %223, %226 : vector<8x128xf32>
    %c57 = arith.constant 57 : index
    %228 = memref.load %arg1[%c57] : memref<64xf32, #tpu.memory_space<smem>>
    %229 = vector.broadcast %228 : f32 to vector<8x128xf32>
    %230 = arith.addf %227, %229 : vector<8x128xf32>
    %c0_16 = arith.constant 0 : index
    %c0_17 = arith.constant 0 : index
    %231 = vector.load %arg3[%c0_16, %c0_17] : memref<8x128xf32, #tpu.memory_space<vmem>>, vector<8x128xf32>
    tpu.vector_store %arg3[%c0_16, %c0_17], %230 {strides = array<i32>} : memref<8x128xf32, #tpu.memory_space<vmem>>, vector<8x128xf32>,
    return
  }
  func.func @transform_0(%arg0: i32) -> i32 {
    %c0_i32 = arith.constant 0 : i32
    %c0_i32_0 = arith.constant 0 : i32
    return %c0_i32 : i32
  }
  func.func @transform_1(%arg0: i32) -> (i32, i32) {
    %c0_i32 = arith.constant 0 : i32
    %c0_i32_0 = arith.constant 0 : i32
    return %arg0, %c0_i32 : i32, i32
  }
  func.func @transform_2(%arg0: i32) -> (i32, i32) {
    %c0_i32 = arith.constant 0 : i32
    %c0_i32_0 = arith.constant 0 : i32
    return %arg0, %c0_i32 : i32, i32
  }
}

</mosaic_0001>

<bundles_post_ra>
// kernel: tpu_custom_call.1
= control target key start
LH: loop header
LB: loop body
LE: loop exit
PB: predicated region body
PF: predicated region fallthrough
CT: control target
= control target key end

     0   :  { %7 = vsyncpa [#allocation5], 0  ;;  %s484_s0 = inlined_call_operand.hbm [shape: f32[64], index: 0, kind: input, shape index: {}]   ;;  %s485_s1 = inlined_call_operand.hbm [shape: f32[8,128], index: 1, kind: input, shape index: {}]   ;;  %s486_s2 = inlined_call_operand.hbm [shape: f32[8,128], index: 2, kind: output, shape index: {}]  }
   0x1   :  { %8 = vsyncpa [#allocation3], 0 }
   0x2   :  { %9 = vsyncpa [#allocation4], 0  ;;  %s15_s11 = sshll.u32 %s484_s0, 4  ;;  %s24_s14 = sshll.u32 %s485_s1, 4  ;;  %s16_s11 = int_to_ptr.hbm [resolvable:$true] %s15_s11  ;;  %s25_s14 = int_to_ptr.hbm [resolvable:$true] %s24_s14 }
   0x3   :  { %s400_s15 = smov [#allocation2]   ;;  %s401_s16 = smov [#allocation6]  }
   0x4   :  { %18 = dma.hbm_to_smem %s16_s11, 16, %s400_s15, [#allocation5]  }
   0x5   :  { %s26_s17 = sshll.u32 %s401_s16, 4  ;;  %s27_s17 = int_to_ptr.vmem [resolvable:$true] %s26_s17 }
   0x6   :  { %29 = dma.hbm_to_vmem [thread:$0]  %s25_s14, 128, %s27_s17, [#allocation3]  }
   0x7   :  { %394 = dma.done.wait [#allocation5], 16  }
   0x8   :  { %395 = vsyncadd [#allocation5], 4294967280 }
   0x9   :  { %396 = dma.done.wait [#allocation3], 128  }
   0xa   :  { %397 = vsyncadd [#allocation3], 4294967168 }
   0xb   :  { %38 = sfence }
   0xc   :  { %s40_s18 = sld [smem:[#allocation2]]  ;;  %v39_v0 = vld [vmem:[#allocation6] sm:$0xff] }
   0xd   :  { %s274_s19 = sld [smem:[#allocation2 + $0x3]] }
   0xe   :  { %s275_s0 = sld [smem:[#allocation2 + $0x1]] }
   0xf   :  { %s276_s20 = sld [smem:[#allocation2 + $0x4]] }
  0x10   :  { %s277_s21 = sld [smem:[#allocation2 + $0x2]] }
  0x11   :  { %s278_s22 = sld [smem:[#allocation2 + $0x5]] }
  0x12   :  { %v41_v1 = vstv %s40_s18  ;;  %s279_s1 = sld [smem:[#allocation2 + $0x6]] }
  0x13   :  { %v42_v2 = vmul.f32 %v41_v1, %v39_v0  ;;  %v44_v3 = vstv %s274_s19  ;;  %s280_s23 = sld [smem:[#allocation2 + $0x9]] }
  0x14   :  { %v48_v4 = vstv %s275_s0  ;;  %s281_s24 = sld [smem:[#allocation2 + $0xc]] }
  0x15   :  { %v45_v5 = vadd.f32 %v44_v3, %v42_v2  ;;  %v49_v6 = vmul.f32 %v48_v4, %v39_v0  ;;  %v51_v7 = vstv %s276_s20  ;;  %s424_s25 = sld [smem:[#allocation2 + $0xf]] }
  0x16   :  { %v55_v8 = vstv %s277_s21  ;;  %s283_s26 = sld [smem:[#allocation2 + $0x7]] }
  0x17   :  { %v46_v9 = vmax.f32 %v45_v5, 0.0  ;;  %v52_v10 = vadd.f32 %v51_v7, %v49_v6  ;;  %v56_v11 = vmul.f32 %v55_v8, %v39_v0  ;;  %v58_v12 = vstv %s278_s22  ;;  %s284_s27 = sld [smem:[#allocation2 + $0xa]] }
  0x18   :  { %v62_v13 = vstv %s279_s1  ;;  %s285_s28 = sld [smem:[#allocation2 + $0xd]] }
  0x19   :  { %v53_v14 = vmax.f32 %v52_v10, 0.0  ;;  %v59_v15 = vadd.f32 %v58_v12, %v56_v11  ;;  %v63_v16 = vmul.f32 %v62_v13, %v46_v9  ;;  %v65_v17 = vstv %s280_s23  ;;  %s426_s29 = sld [smem:[#allocation2 + $0x10]] }
  0x1a   :  { %v69_v18 = vstv %s281_s24  ;;  %s287_s30 = sld [smem:[#allocation2 + $0x8]] }
  0x1b   :  { %v60_v19 = vmax.f32 %v59_v15, 0.0  ;;  %v66_v20 = vmul.f32 %v65_v17, %v53_v14  ;;  %s288_s3 = sld [smem:[#allocation2 + $0xb]]  ;;  %v73_v26 = vstv %s424_s25 }
  0x1c   :  { %v77_v21 = vstv %s283_s26  ;;  %s289_s4 = sld [smem:[#allocation2 + $0xe]] }
  0x1d   :  { %v67_v22 = vadd.f32 %v66_v20, %v63_v16  ;;  %v70_v23 = vmul.f32 %v69_v18, %v60_v19  ;;  %v78_v24 = vmul.f32 %v77_v21, %v46_v9  ;;  %v80_v25 = vstv %s284_s27  ;;  %s428_s5 = sld [smem:[#allocation2 + $0x11]] }
  0x1e   :  { %v81_v27 = vmul.f32 %v80_v25, %v53_v14  ;;  %v84_v28 = vstv %s285_s28  ;;  %s291_s6 = sld [smem:[#allocation2 + $0x12]] }
  0x1f   :  { %v71_v29 = vadd.f32 %v70_v23, %v67_v22  ;;  %v85_v30 = vmul.f32 %v84_v28, %v60_v19  ;;  %s292_s7 = sld [smem:[#allocation2 + $0x15]]  ;;  %v88_v34 = vstv %s426_s29 }
  0x20   :  { %v82_v31 = vadd.f32 %v81_v27, %v78_v24  ;;  %v92_v32 = vstv %s287_s30  ;;  %s431_s8 = sld [smem:[#allocation2 + $0x18]] }
  0x21   :  { %v74_v33 = vadd.f32 %v73_v26, %v71_v29  ;;  %v93_v35 = vmul.f32 %v92_v32, %v46_v9  ;;  %v95_v36 = vstv %s288_s3  ;;  %s434_s9 = sld [smem:[#allocation2 + $0x1b]] }
  0x22   :  { %v86_v37 = vadd.f32 %v85_v30, %v82_v31  ;;  %v96_v38 = vmul.f32 %v95_v36, %v53_v14  ;;  %v99_v39 = vstv %s289_s4  ;;  %s295_s10 = sld [smem:[#allocation2 + $0x13]] }
  0x23   :  { %v75_v40 = vmax.f32 %v74_v33, 0.0  ;;  %v100_v41 = vmul.f32 %v99_v39, %v60_v19  ;;  %s296_s11 = sld [smem:[#allocation2 + $0x16]]  ;;  %v103_v45 = vstv %s428_s5 }
  0x24   :  { %v89_v42 = vadd.f32 %v88_v34, %v86_v37  ;;  %v97_v43 = vadd.f32 %v96_v38, %v93_v35  ;;  %v107_v44 = vstv %s291_s6  ;;  %s297_s12 = sld [smem:[#allocation2 + $0x19]] }
  0x25   :  { %v110_v46 = vstv %s292_s7  ;;  %s437_s13 = sld [smem:[#allocation2 + $0x1c]]  ;;  %v108_v49 = vmul.f32 %v107_v44, %v75_v40 }
  0x26   :  { %v90_v47 = vmax.f32 %v89_v42, 0.0  ;;  %v101_v48 = vadd.f32 %v100_v41, %v97_v43  ;;  %s299_s14 = sld [smem:[#allocation2 + $0x14]]  ;;  %v114_v53 = vstv %s431_s8 }
  0x27   :  { %s300_s15 = sld [smem:[#allocation2 + $0x17]]  ;;  %v118_v0 = vstv %s434_s9 }
  0x28   :  { %v104_v50 = vadd.f32 %v103_v45, %v101_v48  ;;  %v111_v51 = vmul.f32 %v110_v46, %v90_v47  ;;  %v122_v52 = vstv %s295_s10  ;;  %s301_s16 = sld [smem:[#allocation2 + $0x1a]] }
  0x29   :  { %v123_v54 = vmul.f32 %v122_v52, %v75_v40  ;;  %v125_v55 = vstv %s296_s11  ;;  %s440_s17 = sld [smem:[#allocation2 + $0x1d]] }
  0x2a   :  { %v105_v56 = vmax.f32 %v104_v50, 0.0  ;;  %v112_v57 = vadd.f32 %v111_v51, %v108_v49  ;;  %v126_v58 = vmul.f32 %v125_v55, %v90_v47  ;;  %v129_v59 = vstv %s297_s12  ;;  %s442_s18 = sld [smem:[#allocation2 + $0x1e]] }
  0x2b   :  { %s444_s19 = sld [smem:[#allocation2 + $0x21]]  ;;  %v133_v1 = vstv %s437_s13 }
  0x2c   :  { %v115_v60 = vmul.f32 %v114_v53, %v105_v56  ;;  %v127_v61 = vadd.f32 %v126_v58, %v123_v54  ;;  %v130_v62 = vmul.f32 %v129_v59, %v105_v56  ;;  %v137_v63 = vstv %s299_s14  ;;  %s446_s0 = sld [smem:[#allocation2 + $0x24]] }
  0x2d   :  { %v138_v2 = vmul.f32 %v137_v63, %v75_v40  ;;  %v140_v3 = vstv %s300_s15  ;;  %s450_s20 = sld [smem:[#allocation2 + $0x27]] }
  0x2e   :  { %v116_v4 = vadd.f32 %v115_v60, %v112_v57  ;;  %v131_v5 = vadd.f32 %v130_v62, %v127_v61  ;;  %v141_v6 = vmul.f32 %v140_v3, %v90_v47  ;;  %v144_v7 = vstv %s301_s16  ;;  %s307_s21 = sld [smem:[#allocation2 + $0x1f]]  ;;  %s402_s16 = smov [#allocation7]  }
  0x2f   :  { %v145_v8 = vmul.f32 %v144_v7, %v105_v56  ;;  %s308_s22 = sld [smem:[#allocation2 + $0x22]]  ;;  %v148_v12 = vstv %s440_s17  ;;  %s261_s17 = sshll.u32 %s402_s16, 4  ;;  %s262_s17 = int_to_ptr.vmem [resolvable:$true] %s261_s17 }
  0x30   :  { %v119_v9 = vadd.f32 %v118_v0, %v116_v4  ;;  %v134_v10 = vadd.f32 %v133_v1, %v131_v5  ;;  %v142_v11 = vadd.f32 %v141_v6, %v138_v2  ;;  %s309_s1 = sld [smem:[#allocation2 + $0x25]]  ;;  %v152_v13 = vstv %s442_s18 }
  0x31   :  { %v155_v14 = vstv %s444_s19  ;;  %s455_s23 = sld [smem:[#allocation2 + $0x28]] }
  0x32   :  { %v120_v15 = vmax.f32 %v119_v9, 0.0  ;;  %v135_v16 = vmax.f32 %v134_v10, 0.0  ;;  %v146_v17 = vadd.f32 %v145_v8, %v142_v11  ;;  %s311_s24 = sld [smem:[#allocation2 + $0x20]]  ;;  %v159_v22 = vstv %s446_s0  ;;  %s263_s0 = sshll.u32 %s486_s2, 4  ;;  %s264_s0 = int_to_ptr.hbm [resolvable:$true] %s263_s0 }
  0x33   :  { %s312_s25 = sld [smem:[#allocation2 + $0x23]]  ;;  %v163_v33 = vstv %s450_s20 }
  0x34   :  { %v149_v18 = vadd.f32 %v148_v12, %v146_v17  ;;  %v153_v19 = vmul.f32 %v152_v13, %v120_v15  ;;  %v156_v20 = vmul.f32 %v155_v14, %v135_v16  ;;  %v167_v21 = vstv %s307_s21  ;;  %s313_s26 = sld [smem:[#allocation2 + $0x26]] }
  0x35   :  { %v168_v23 = vmul.f32 %v167_v21, %v120_v15  ;;  %v170_v24 = vstv %s308_s22  ;;  %s458_s27 = sld [smem:[#allocation2 + $0x29]] }
  0x36   :  { %v150_v25 = vmax.f32 %v149_v18, 0.0  ;;  %v157_v26 = vadd.f32 %v156_v20, %v153_v19  ;;  %v171_v27 = vmul.f32 %v170_v24, %v135_v16  ;;  %v174_v28 = vstv %s309_s1  ;;  %s460_s28 = sld [smem:[#allocation2 + $0x2a]] }
  0x37   :  { %s462_s29 = sld [smem:[#allocation2 + $0x2d]]  ;;  %v178_v34 = vstv %s455_s23 }
  0x38   :  { %v160_v29 = vmul.f32 %v159_v22, %v150_v25  ;;  %v172_v30 = vadd.f32 %v171_v27, %v168_v23  ;;  %v175_v31 = vmul.f32 %v174_v28, %v150_v25  ;;  %v182_v32 = vstv %s311_s24  ;;  %s464_s30 = sld [smem:[#allocation2 + $0x30]] }
  0x39   :  { %v183_v35 = vmul.f32 %v182_v32, %v120_v15  ;;  %v185_v36 = vstv %s312_s25  ;;  %s468_s3 = sld [smem:[#allocation2 + $0x33]] }
  0x3a   :  { %v161_v37 = vadd.f32 %v160_v29, %v157_v26  ;;  %v176_v38 = vadd.f32 %v175_v31, %v172_v30  ;;  %v186_v39 = vmul.f32 %v185_v36, %v135_v16  ;;  %v189_v40 = vstv %s313_s26  ;;  %s319_s4 = sld [smem:[#allocation2 + $0x2b]] }
  0x3b   :  { %v190_v41 = vmul.f32 %v189_v40, %v150_v25  ;;  %s320_s5 = sld [smem:[#allocation2 + $0x2e]]  ;;  %v193_v45 = vstv %s458_s27 }
  0x3c   :  { %v164_v42 = vadd.f32 %v163_v33, %v161_v37  ;;  %v179_v43 = vadd.f32 %v178_v34, %v176_v38  ;;  %v187_v44 = vadd.f32 %v186_v39, %v183_v35  ;;  %s321_s6 = sld [smem:[#allocation2 + $0x31]]  ;;  %v197_v46 = vstv %s460_s28 }
  0x3d   :  { %v200_v47 = vstv %s462_s29  ;;  %s473_s7 = sld [smem:[#allocation2 + $0x34]] }
  0x3e   :  { %v165_v48 = vmax.f32 %v164_v42, 0.0  ;;  %v180_v49 = vmax.f32 %v179_v43, 0.0  ;;  %v191_v50 = vadd.f32 %v190_v41, %v187_v44  ;;  %s323_s8 = sld [smem:[#allocation2 + $0x2c]]  ;;  %v204_v55 = vstv %s464_s30 }
  0x3f   :  { %s324_s9 = sld [smem:[#allocation2 + $0x2f]]  ;;  %v208_v2 = vstv %s468_s3 }
  0x40   :  { %v194_v51 = vadd.f32 %v193_v45, %v191_v50  ;;  %v198_v52 = vmul.f32 %v197_v46, %v165_v48  ;;  %v201_v53 = vmul.f32 %v200_v47, %v180_v49  ;;  %v212_v54 = vstv %s319_s4  ;;  %s325_s10 = sld [smem:[#allocation2 + $0x32]] }
  0x41   :  { %v213_v56 = vmul.f32 %v212_v54, %v165_v48  ;;  %v215_v57 = vstv %s320_s5  ;;  %s476_s11 = sld [smem:[#allocation2 + $0x35]] }
  0x42   :  { %v195_v58 = vmax.f32 %v194_v51, 0.0  ;;  %v202_v59 = vadd.f32 %v201_v53, %v198_v52  ;;  %v216_v60 = vmul.f32 %v215_v57, %v180_v49  ;;  %v219_v61 = vstv %s321_s6  ;;  %s327_s12 = sld [smem:[#allocation2 + $0x36]] }
  0x43   :  { %s328_s13 = sld [smem:[#allocation2 + $0x37]]  ;;  %v223_v3 = vstv %s473_s7 }
  0x44   :  { %v205_v62 = vmul.f32 %v204_v55, %v195_v58  ;;  %v217_v63 = vadd.f32 %v216_v60, %v213_v56  ;;  %v220_v0 = vmul.f32 %v219_v61, %v195_v58  ;;  %v227_v1 = vstv %s323_s8  ;;  %s329_s14 = sld [smem:[#allocation2 + $0x38]] }
  0x45   :  { %v228_v4 = vmul.f32 %v227_v1, %v165_v48  ;;  %v230_v5 = vstv %s324_s9  ;;  %s330_s15 = sld [smem:[#allocation2 + $0x39]] }
  0x46   :  { %v206_v6 = vadd.f32 %v205_v62, %v202_v59  ;;  %v221_v7 = vadd.f32 %v220_v0, %v217_v63  ;;  %v231_v8 = vmul.f32 %v230_v5, %v180_v49  ;;  %v234_v9 = vstv %s325_s10 }
  0x47   :  { %v235_v10 = vmul.f32 %v234_v9, %v195_v58  ;;  %v238_v14 = vstv %s476_s11 }
  0x48   :  { %v209_v11 = vadd.f32 %v208_v2, %v206_v6  ;;  %v224_v12 = vadd.f32 %v223_v3, %v221_v7  ;;  %v232_v13 = vadd.f32 %v231_v8, %v228_v4  ;;  %v242_v15 = vstv %s327_s12 }
  0x49   :  { %v245_v16 = vstv %s328_s13 }
  0x4a   :  { %v210_v17 = vmax.f32 %v209_v11, 0.0  ;;  %v225_v18 = vmax.f32 %v224_v12, 0.0  ;;  %v236_v19 = vadd.f32 %v235_v10, %v232_v13  ;;  %v249_v23 = vstv %s329_s14 }
  0x4b   :  { %v253_v27 = vstv %s330_s15 }
  0x4c   :  { %v239_v20 = vadd.f32 %v238_v14, %v236_v19  ;;  %v243_v21 = vmul.f32 %v242_v15, %v210_v17  ;;  %v246_v22 = vmul.f32 %v245_v16, %v225_v18 }
  0x4e   :  { %v240_v24 = vmax.f32 %v239_v20, 0.0  ;;  %v247_v25 = vadd.f32 %v246_v22, %v243_v21 }
  0x50   :  { %v250_v26 = vmul.f32 %v249_v23, %v240_v24 }
  0x52   :  { %v251_v28 = vadd.f32 %v250_v26, %v247_v25 }
  0x54   :  { %v254_v29 = vadd.f32 %v253_v27, %v251_v28 }
  0x56   :  { %255 = vst [vmem:[#allocation7] sm:$0xff] %v254_v29 }
  0x57   :  { %266 = dma.vmem_to_hbm [thread:$0]  %s262_s17, 128, %s264_s0, [#allocation4]  }
  0x58   :  { %398 = dma.done.wait [#allocation4], 128  }
  0x59   :  { %399 = vsyncadd [#allocation4], 4294967168 }
  0x5a   :  { %271 = vsyncpa [#allocation3], 1 }
  0x5b   :  { %272 = vsyncpa [#allocation4], 1 }
  0x5c   :  { %273 = vsyncpa [#allocation5], 1 }

</bundles_post_ra>
